<compile_context>
chip_gen: v6e
topology: v6e:2x2x1
jax: 0.10.0
libtpu: 0.0.40
codegen_flags: <defaults>
</compile_context>

<pallas_src>
import functools

import jax
import jax.numpy as jnp
from jax.experimental import pallas as pl
from jax.experimental.pallas import tpu as pltpu

SUBLANES = 8


def _device_kind():
    try:
        return jax.devices()[0].device_kind.lower()
    except Exception:
        return ""


def _default_num_slices():
    # 2 TensorCores per chip on v7x; single TC on v5e / v6e.
    return 2 if "v7" in _device_kind() else 1


def _default_block_byte_budget():
    # Per-input-block budget: 2 inputs x 2 pipeline buffers x budget must stay
    # inside the default scoped VMEM limit (16 MiB on v5e, 32 MiB on v6e/v7x).
    kind = _device_kind()
    if "v5 lite" in kind or "v5lite" in kind or "v5e" in kind:
        return 2 * 1024 * 1024
    return 4 * 1024 * 1024


def _wpl_kernel(x_ref, y_ref, out_ref, *, T, rows, hw, steps, tile_rows,
                hw_block, inv_norm, mask_rows, mask_cols):
    i = pl.program_id(0)          # TensorCore slice          ("parallel")
    k = pl.program_id(1)          # H*W tile                  ("arbitrary")
    j = pl.program_id(2)          # row-streaming reduction   ("arbitrary")

    @pl.when(j == 0)
    def _():
        out_ref[...] = jnp.zeros_like(out_ref)

    x = x_ref[...].astype(jnp.float32)        # in-kernel upcast (bf16 inputs OK)
    y = y_ref[...].astype(jnp.float32)
    d = x - y
    dsq = d * d                               # (tile_rows, hw_block)

    # Per-row weight generated in-kernel: global row r -> t = r % T,
    # weight = (T - t) / (N*C*H*W*T^2)  (normalization folded in).
    row0 = (i * steps + j) * tile_rows
    r_idx = row0 + jax.lax.broadcasted_iota(jnp.int32, (tile_rows, 1), 0)
    t_idx = r_idx % T
    w = (jnp.float32(T) - t_idx.astype(jnp.float32)) * jnp.float32(inv_norm)

    contrib = w * dsq                          # (tile_rows, hw_block)

    # Mask ragged tails: OOB block contents are unspecified, and 0*garbage can
    # be NaN, so select on a validity predicate instead of multiplying by 0.
    valid = None
    if mask_rows:
        valid = r_idx < rows                                           # (tile_rows, 1)
    if mask_cols:
        col = k * hw_block + jax.lax.broadcasted_iota(jnp.int32, (1, hw_block), 1)
        col_ok = col < hw                                              # (1, hw_block)
        valid = col_ok if valid is None else jnp.logical_and(valid, col_ok)
    if valid is not None:
        contrib = jnp.where(valid, contrib, 0.0)

    # Fold (tile_rows, hw_block) -> (8, hw_block) with vreg-aligned elementwise
    # VPU adds only; the tiny cross-lane reduce happens once, in the wrapper.
    out_ref[...] += contrib.reshape(tile_rows // SUBLANES, SUBLANES,
                                    hw_block).sum(axis=0)


def weighted_pred_loss(x, target, *, num_slices=None, block_byte_budget=None):
    """WeightedPredLoss.forward(x, target) for 5-D (N, C, T, H, W) inputs."""
    assert x.shape == target.shape and x.ndim == 5
    N, C, T, H, W = x.shape
    hw = H * W
    rows = N * C * T
    dtype_bytes = x.dtype.itemsize

    if num_slices is None:
        num_slices = _default_num_slices()
    if block_byte_budget is None:
        block_byte_budget = _default_block_byte_budget()

    # Pure reshape views of the row-major NCTHW layout (no transpose, no pad).
    x2 = x.reshape(rows, hw)
    y2 = target.reshape(rows, hw)

    # ---- block sizing (in bytes, not element counts) -----------------------
    if SUBLANES * hw * dtype_bytes > block_byte_budget and hw > 128:
        # Huge frames: tile the H*W axis in lane-dense 128-multiple chunks so
        # even the minimal 8-row block fits VMEM (binding on v7x: 64 MiB/TC).
        hw_block = max(128,
                       (block_byte_budget // (SUBLANES * dtype_bytes)) // 128 * 128)
        tile_rows = SUBLANES
    else:
        hw_block = hw
        tile_rows = max(SUBLANES,
                        (block_byte_budget // max(hw_block * dtype_bytes, 1))
                        // SUBLANES * SUBLANES)
    hw_tiles = pl.cdiv(hw, hw_block)

    # Never let a single row block exceed the array extent (keeps us on the
    # well-supported "partial edge block" path; minimum block is 8 rows).
    tile_rows = min(tile_rows, max(SUBLANES, (rows // SUBLANES) * SUBLANES))
    row_tiles = pl.cdiv(rows, tile_rows)
    nslices = max(1, min(num_slices, row_tiles))
    steps = pl.cdiv(row_tiles, nslices)
    # Shrink tile_rows to just cover the data -> minimal masked tail.
    tile_rows = pl.cdiv(pl.cdiv(rows, nslices * steps), SUBLANES) * SUBLANES

    rows_covered = nslices * steps * tile_rows
    cols_covered = hw_tiles * hw_block
    mask_rows = rows_covered > rows
    mask_cols = cols_covered > hw

    inv_norm = 1.0 / (float(N * C * H * W) * float(T) * float(T))

    kernel = functools.partial(
        _wpl_kernel, T=T, rows=rows, hw=hw, steps=steps, tile_rows=tile_rows,
        hw_block=hw_block, inv_norm=inv_norm,
        mask_rows=mask_rows, mask_cols=mask_cols)

    partials = pl.pallas_call(
        kernel,
        out_shape=jax.ShapeDtypeStruct((nslices * SUBLANES, cols_covered),
                                       jnp.float32),
        grid_spec=pltpu.PrefetchScalarGridSpec(
            num_scalar_prefetch=0,
            grid=(nslices, hw_tiles, steps),
            in_specs=[
                pl.BlockSpec((tile_rows, hw_block),
                             lambda i, k, j: (i * steps + j, k)),
                pl.BlockSpec((tile_rows, hw_block),
                             lambda i, k, j: (i * steps + j, k)),
            ],
            out_specs=pl.BlockSpec((SUBLANES, hw_block), lambda i, k, j: (i, k)),
        ),
        compiler_params=pltpu.CompilerParams(
            dimension_semantics=("parallel", "arbitrary", "arbitrary"),
        ),
        cost_estimate=pl.CostEstimate(
            flops=5 * rows * hw,
            transcendentals=0,
            bytes_accessed=2 * rows * hw * dtype_bytes
            + 4 * nslices * SUBLANES * cols_covered,
        ),
    )(x2, y2)

    # Tiny final cross-lane reduce (<= nslices*8*cols_covered f32) outside the
    # kernel; normalization was already folded into the per-row weight.
    return jnp.sum(partials)


def _reference_weighted_pred_loss(x, target):
    """Direct JAX transcription of the PyTorch forward."""
    pred_len = target.shape[2]
    xf = x.astype(jnp.float32)
    tf = target.astype(jnp.float32)
    err = jnp.float32(0.0)
    for i in range(pred_len):
        w = float(pred_len - i)
        err = err + jnp.mean((xf[:, :, i, :, :] - tf[:, :, i, :, :]) ** 2) * w
    return err / float(pred_len ** 2)


if __name__ == "__main__":
    key = jax.random.PRNGKey(0)
    k1, k2, k3, k4 = jax.random.split(key, 4)

    # Test 1: aligned lane-dense shape (hw = 256), f32, single-block grid.
    x = jax.random.normal(k1, (2, 4, 8, 16, 16), dtype=jnp.float32)
    t = jax.random.normal(k2, (2, 4, 8, 16, 16), dtype=jnp.float32)
    loss = jax.block_until_ready(weighted_pred_loss(x, t))
    ref = _reference_weighted_pred_loss(x, t)
    assert jnp.allclose(loss, ref, rtol=1e-5, atol=1e-6), (loss, ref)

    # Test 2: odd shapes + bf16 + tiny block budget -> exercises H*W tiling,
    # ragged row/col masking (no jnp.pad) and multi-step accumulation.
    x2 = jax.random.normal(k3, (2, 3, 5, 15, 13), dtype=jnp.float32).astype(jnp.bfloat16)
    t2 = jax.random.normal(k4, (2, 3, 5, 15, 13), dtype=jnp.float32).astype(jnp.bfloat16)
    loss2 = jax.block_until_ready(weighted_pred_loss(x2, t2, block_byte_budget=1024))
    ref2 = _reference_weighted_pred_loss(x2, t2)
    assert jnp.allclose(loss2, ref2, rtol=1e-4, atol=1e-6), (loss2, ref2)

    # Test 3: forced 2-slice ("parallel" axis, v7x-style) grid + multi-step
    # reduction on the aligned shape.
    loss3 = jax.block_until_ready(
        weighted_pred_loss(x, t, num_slices=2, block_byte_budget=16 * 1024))
    assert jnp.allclose(loss3, ref, rtol=1e-5, atol=1e-6), (loss3, ref)

    print("KERNEL_OK")
</pallas_src>

<mosaic_0001>
module attributes {stable_mosaic.version = 11 : i64} {
  func.func @_wpl_kernel(%arg0: i32, %arg1: i32, %arg2: i32, %arg3: memref<64x256xf32, #tpu.memory_space<vmem>>, %arg4: memref<64x256xf32, #tpu.memory_space<vmem>>, %arg5: memref<8x256xf32, #tpu.memory_space<vmem>>) attributes {dimension_semantics = [#tpu.dimension_semantics<parallel>, #tpu.dimension_semantics<arbitrary>, #tpu.dimension_semantics<arbitrary>], iteration_bounds = array<i64: 1, 1, 1>, scalar_prefetch = 0 : i64, scratch_operands = 0 : i64, tpu.core_type = #tpu.core_type<tc>, window_params = [{transform_indices = @transform_0, window_bounds = array<i64: 64, 256>}, {transform_indices = @transform_1, window_bounds = array<i64: 64, 256>}, {transform_indices = @transform_2, window_bounds = array<i64: 8, 256>}]} {
    %c0_i32 = arith.constant 0 : i32
    %0 = arith.cmpi eq, %arg2, %c0_i32 : i32
    %1 = arith.extui %0 : i1 to i32
    %c0_i32_0 = arith.constant 0 : i32
    %2 = arith.cmpi ne, %1, %c0_i32_0 : i32
    scf.if %2 {
      %cst_15 = arith.constant 0.000000e+00 : f32
      %41 = vector.broadcast %cst_15 : f32 to vector<8x256xf32>
      %c0_16 = arith.constant 0 : index
      %c0_17 = arith.constant 0 : index
      %42 = vector.load %arg5[%c0_16, %c0_17] : memref<8x256xf32, #tpu.memory_space<vmem>>, vector<8x256xf32>
      tpu.vector_store %arg5[%c0_16, %c0_17], %41 {strides = array<i32>} : memref<8x256xf32, #tpu.memory_space<vmem>>, vector<8x256xf32>,
    } else {
    }
    %c0 = arith.constant 0 : index
    %c0_1 = arith.constant 0 : index
    %3 = vector.load %arg3[%c0, %c0_1] : memref<64x256xf32, #tpu.memory_space<vmem>>, vector<64x256xf32>
    %c0_2 = arith.constant 0 : index
    %c0_3 = arith.constant 0 : index
    %4 = vector.load %arg4[%c0_2, %c0_3] : memref<64x256xf32, #tpu.memory_space<vmem>>, vector<64x256xf32>
    %5 = arith.subf %3, %4 : vector<64x256xf32>
    %6 = arith.mulf %5, %5 : vector<64x256xf32>
    %c1_i32 = arith.constant 1 : i32
    %7 = arith.muli %arg0, %c1_i32 : i32
    %8 = arith.addi %7, %arg2 : i32
    %c64_i32 = arith.constant 64 : i32
    %9 = arith.muli %8, %c64_i32 : i32
    %10 = tpu.iota {dimensions = array<i32: 0>} : vector<64x1xi32>
    %11 = vector.broadcast %9 : i32 to vector<64x1xi32>
    %12 = arith.addi %11, %10 : vector<64x1xi32>
    %c8_i32 = arith.constant 8 : i32
    %c0_i32_4 = arith.constant 0 : i32
    %13 = arith.cmpi eq, %c8_i32, %c0_i32_4 : i32
    %c1_i32_5 = arith.constant 1 : i32
    %14 = arith.select %13, %c1_i32_5, %c8_i32 : i32
    %15 = vector.broadcast %14 : i32 to vector<64x1xi32>
    %16 = arith.remsi %12, %15 : vector<64x1xi32>
    %c0_i32_6 = arith.constant 0 : i32
    %17 = vector.broadcast %c0_i32_6 : i32 to vector<64x1xi32>
    %18 = arith.cmpi ne, %16, %17 : vector<64x1xi32>
    %c0_i32_7 = arith.constant 0 : i32
    %19 = vector.broadcast %c0_i32_7 : i32 to vector<64x1xi32>
    %20 = arith.cmpi slt, %16, %19 : vector<64x1xi32>
    %c0_i32_8 = arith.constant 0 : i32
    %21 = arith.cmpi slt, %14, %c0_i32_8 : i32
    %22 = vector.broadcast %21 : i1 to vector<64x1xi1>
    %23 = vector.broadcast %22 : vector<64x1xi1> to vector<64x1xi1>
    %24 = arith.xori %20, %23 : vector<64x1xi1>
    %25 = arith.andi %24, %18 : vector<64x1xi1>
    %26 = vector.broadcast %14 : i32 to vector<64x1xi32>
    %27 = arith.addi %16, %26 : vector<64x1xi32>
    %28 = arith.select %25, %27, %16 : vector<64x1xi1>, vector<64x1xi32>
    %29 = arith.sitofp %28 : vector<64x1xi32> to vector<64x1xf32>
    %cst = arith.constant 8.000000e+00 : f32
    %30 = vector.broadcast %cst : f32 to vector<64x1xf32>
    %31 = arith.subf %30, %29 : vector<64x1xf32>
    %cst_9 = arith.constant 7.62939453E-6 : f32
    %32 = vector.broadcast %cst_9 : f32 to vector<64x1xf32>
    %33 = arith.mulf %31, %32 : vector<64x1xf32>
    %34 = vector.broadcast %33 : vector<64x1xf32> to vector<64x256xf32>
    %35 = arith.mulf %34, %6 : vector<64x256xf32>
    %c0_10 = arith.constant 0 : index
    %c0_11 = arith.constant 0 : index
    %36 = vector.load %arg5[%c0_10, %c0_11] : memref<8x256xf32, #tpu.memory_space<vmem>>, vector<8x256xf32>
    %37 = vector.shape_cast %35 : vector<64x256xf32> to vector<8x8x256xf32>
    %cst_12 = arith.constant dense<0.000000e+00> : vector<8x256xf32>
    %38 = vector.multi_reduction <add>, %37, %cst_12 [0] : vector<8x8x256xf32> to vector<8x256xf32>
    %39 = arith.addf %36, %38 : vector<8x256xf32>
    %c0_13 = arith.constant 0 : index
    %c0_14 = arith.constant 0 : index
    %40 = vector.load %arg5[%c0_13, %c0_14] : memref<8x256xf32, #tpu.memory_space<vmem>>, vector<8x256xf32>
    tpu.vector_store %arg5[%c0_13, %c0_14], %39 {strides = array<i32>} : memref<8x256xf32, #tpu.memory_space<vmem>>, vector<8x256xf32>,
    return
  }
  func.func @transform_0(%arg0: i32, %arg1: i32, %arg2: i32) -> (i32, i32) {
    %c1_i32 = arith.constant 1 : i32
    %0 = arith.muli %arg0, %c1_i32 : i32
    %1 = arith.addi %0, %arg2 : i32
    %c0_i32 = arith.constant 0 : i32
    return %1, %arg1 : i32, i32
  }
  func.func @transform_1(%arg0: i32, %arg1: i32, %arg2: i32) -> (i32, i32) {
    %c1_i32 = arith.constant 1 : i32
    %0 = arith.muli %arg0, %c1_i32 : i32
    %1 = arith.addi %0, %arg2 : i32
    %c0_i32 = arith.constant 0 : i32
    return %1, %arg1 : i32, i32
  }
  func.func @transform_2(%arg0: i32, %arg1: i32, %arg2: i32) -> (i32, i32) {
    %c0_i32 = arith.constant 0 : i32
    return %arg0, %arg1 : i32, i32
  }
}

</mosaic_0001>

<bundles_post_ra>
// kernel: tpu_custom_call.1
= control target key start
LH: loop header
LB: loop body
LE: loop exit
PB: predicated region body
PF: predicated region fallthrough
CT: control target
= control target key end

     0   :  { %7 = vsyncpa [#allocation3], 0  ;;  %s417_s0 = inlined_call_operand.hbm [shape: f32[64,256], index: 0, kind: input, shape index: {}]   ;;  %s418_s1 = inlined_call_operand.hbm [shape: f32[64,256], index: 1, kind: input, shape index: {}]   ;;  %s419_s2 = inlined_call_operand.hbm [shape: f32[8,256], index: 2, kind: output, shape index: {}]  }
   0x1   :  { %8 = vsyncpa [#allocation6], 0 }
   0x2   :  { %9 = vsyncpa [#allocation4], 0  ;;  %s388_s9 = smov [#allocation2]  }
   0x3   :  { %s20_s10 = sshll.u32 %s388_s9, 4  ;;  %s21_s10 = int_to_ptr.vmem [resolvable:$true] %s20_s10 }
   0x4   :  { %s330_s11 = scalar_lea.vmem %s21_s10, 2048  ;;  %p335_p1 = scmp.lt.s32.totalorder %s21_s10, %s21_s10 }
   0x5   :  { %p331_p0 = scmp.ne.s32.totalorder %s21_s10, %s330_s11  ;;  %p336_p2 = scmp.lt.s32.totalorder %s330_s11, %s330_s11 }
   0x7   :  { %p337_p3 = por %p336_p2, %p335_p1 }
   0x9   :  { %p338_p4 = pnand %p337_p3, %p331_p0 }
   0xb   :  { %341 = shalt.err (!%p338_p4)
}
   0xc   :  { %s389_s12 = smov 256   ;;  %s390_s13 = smov 16  }
   0xd   :  { %26 = dma.hbm_to_vmem [thread:$0]  %s417_s0, 2048, %s21_s10, [#allocation3], %s389_s12, %s389_s12, %s390_s13  }
   0xe   :  { %s391_s16 = smov [#allocation5]  }
   0xf   :  { %s37_s17 = sshll.u32 %s391_s16, 4  ;;  %s38_s17 = int_to_ptr.vmem [resolvable:$true] %s37_s17 }
  0x10   :  { %s350_s18 = scalar_lea.vmem %s38_s17, 2048  ;;  %p355_p6 = scmp.lt.s32.totalorder %s38_s17, %s38_s17 }
  0x11   :  { %p351_p5 = scmp.ne.s32.totalorder %s38_s17, %s350_s18  ;;  %p356_p7 = scmp.lt.s32.totalorder %s350_s18, %s350_s18 }
  0x13   :  { %p357_p8 = por %p356_p7, %p355_p6 }
  0x15   :  { %p358_p9 = pnand %p357_p8, %p351_p5 }
  0x17   :  { %361 = shalt.err (!%p358_p9)
}
  0x18   :  { %43 = dma.hbm_to_vmem [thread:$0]  %s418_s1, 2048, %s38_s17, [#allocation6], %s389_s12, %s389_s12, %s390_s13  }
  0x19   :  { %382 = dma.done.wait [#allocation3], 2048  }
  0x1a   :  { %383 = vsyncadd [#allocation3], 4294965248 }
  0x1b   :  { %384 = dma.done.wait [#allocation6], 2048  }
  0x1c   :  { %385 = vsyncadd [#allocation6], 4294965248  ;;  %v126_v0 = vlaneseq  ;;  %v60_v14 = vld [vmem:[#allocation2] sm:$0xff]  ;;  %v62_v15 = vld [vmem:[#allocation2 + $0x10] sm:$0xff]  ;;  %s392_s0 = smov [#allocation7]  }
  0x1d   :  { %v64_v16 = vld [vmem:[#allocation2 + $0x20] sm:$0xff]  ;;  %v66_v19 = vld [vmem:[#allocation2 + $0x30] sm:$0xff]  ;;  %v61_v60 = vld [vmem:[#allocation2 + $0x8] sm:$0xff]  ;;  %s306_s1 = sshll.u32 %s392_s0, 4  ;;  %s307_s1 = int_to_ptr.vmem [resolvable:$true] %s306_s1 }
  0x1e   :  { %v127_v1 = vshrl.u32 %v126_v0, 7  ;;  %v68_v20 = vld [vmem:[#allocation2 + $0x40] sm:$0xff]  ;;  %v70_v21 = vld [vmem:[#allocation2 + $0x50] sm:$0xff]  ;;  %v63_v61 = vld [vmem:[#allocation2 + $0x18] sm:$0xff]  ;;  %s362_s21 = scalar_lea.vmem %s307_s1, 256  ;;  %p367_p11 = scmp.lt.s32.totalorder %s307_s1, %s307_s1 }
  0x1f   :  { %v72_v25 = vld [vmem:[#allocation2 + $0x60] sm:$0xff]  ;;  %v74_v26 = vld [vmem:[#allocation2 + $0x70] sm:$0xff]  ;;  %v65_v62 = vld [vmem:[#allocation2 + $0x28] sm:$0xff]  ;;  %p363_p10 = scmp.ne.s32.totalorder %s307_s1, %s362_s21  ;;  %p368_p12 = scmp.lt.s32.totalorder %s362_s21, %s362_s21 }
  0x20   :  { %v128_v2 = vadd.s32 8, %v127_v1  ;;  %v129_v3 = vadd.s32 16, %v127_v1  ;;  %v130_v4 = vadd.s32 24, %v127_v1  ;;  %v131_v5 = vadd.s32 32, %v127_v1  ;;  %v76_v27 = vld [vmem:[#allocation5] sm:$0xff]  ;;  %v78_v30 = vld [vmem:[#allocation5 + $0x10] sm:$0xff] }
  0x21   :  { %v132_v6 = vadd.s32 40, %v127_v1  ;;  %v133_v7 = vadd.s32 48, %v127_v1  ;;  %v134_v8 = vadd.s32 56, %v127_v1  ;;  %v148_v9 = vand.u32 7, %v127_v1  ;;  %v80_v31 = vld [vmem:[#allocation5 + $0x20] sm:$0xff]  ;;  %v82_v32 = vld [vmem:[#allocation5 + $0x30] sm:$0xff]  ;;  %p369_p13 = por %p368_p12, %p367_p11 }
  0x22   :  { %v155_v10 = vand.u32 7, %v128_v2  ;;  %v162_v11 = vand.u32 7, %v129_v3  ;;  %v169_v12 = vand.u32 7, %v130_v4  ;;  %v176_v13 = vand.u32 7, %v131_v5  ;;  %v84_v36 = vld [vmem:[#allocation5 + $0x40] sm:$0xff]  ;;  %v86_v37 = vld [vmem:[#allocation5 + $0x50] sm:$0xff] }
  0x23   :  { %v183_v17 = vand.u32 7, %v132_v6  ;;  %v240_v18 = vcvt.s32.f32 %v148_v9  ;;  %v190_v28 = vand.u32 7, %v133_v7  ;;  %v92_v33 = vsub.f32 %v60_v14, %v76_v27  ;;  %v88_v38 = vld [vmem:[#allocation5 + $0x60] sm:$0xff]  ;;  %v90_v43 = vld [vmem:[#allocation5 + $0x70] sm:$0xff]  ;;  %v67_v3 = vld [vmem:[#allocation2 + $0x38] sm:$0xff]  ;;  %p370_p0 = pnand %p369_p13, %p363_p10 }
  0x24   :  { %v241_v22 = vcvt.s32.f32 %v155_v10  ;;  %v242_v23 = vcvt.s32.f32 %v162_v11  ;;  %v243_v24 = vcvt.s32.f32 %v169_v12  ;;  %v244_v29 = vcvt.s32.f32 %v176_v13  ;;  %v69_v4 = vld [vmem:[#allocation2 + $0x48] sm:$0xff]  ;;  %v79_v10 = vld [vmem:[#allocation5 + $0x18] sm:$0xff] }
  0x25   :  { %v197_v34 = vand.u32 7, %v134_v8  ;;  %v245_v35 = vcvt.s32.f32 %v183_v17  ;;  %v94_v39 = vsub.f32 %v62_v15, %v78_v30  ;;  %v96_v40 = vsub.f32 %v64_v16, %v80_v31  ;;  %v77_v5 = vld [vmem:[#allocation5 + $0x8] sm:$0xff]  ;;  %v83_v12 = vld [vmem:[#allocation5 + $0x38] sm:$0xff] }
  0x26   :  { %v98_v41 = vsub.f32 %v66_v19, %v82_v32  ;;  %v248_v42 = vsub.f32 8.0, %v240_v18  ;;  %v100_v44 = vsub.f32 %v68_v20, %v84_v36  ;;  %v249_v45 = vsub.f32 8.0, %v241_v22  ;;  %v81_v11 = vld [vmem:[#allocation5 + $0x28] sm:$0xff]  ;;  %v71_v17 = vld [vmem:[#allocation2 + $0x58] sm:$0xff] }
  0x27   :  { %v250_v46 = vsub.f32 8.0, %v242_v23  ;;  %v251_v47 = vsub.f32 8.0, %v243_v24  ;;  %v102_v48 = vsub.f32 %v70_v21, %v86_v37  ;;  %v108_v49 = vmul.f32 %v92_v33, %v92_v33  ;;  %v85_v18 = vld [vmem:[#allocation5 + $0x48] sm:$0xff]  ;;  %v87_v19 = vld [vmem:[#allocation5 + $0x58] sm:$0xff] }
  0x28   :  { %v246_v50 = vcvt.s32.f32 %v190_v28  ;;  %v252_v51 = vsub.f32 8.0, %v244_v29  ;;  %v104_v52 = vsub.f32 %v72_v25, %v88_v38  ;;  %v106_v53 = vsub.f32 %v74_v26, %v90_v43  ;;  %v73_v25 = vld [vmem:[#allocation2 + $0x68] sm:$0xff]  ;;  %v91_v36 = vld [vmem:[#allocation5 + $0x78] sm:$0xff] }
  0x29   :  { %v110_v54 = vmul.f32 %v94_v39, %v94_v39  ;;  %v112_v55 = vmul.f32 %v96_v40, %v96_v40  ;;  %v114_v56 = vmul.f32 %v98_v41, %v98_v41  ;;  %v247_v57 = vcvt.s32.f32 %v197_v34  ;;  %v89_v26 = vld [vmem:[#allocation5 + $0x68] sm:$0xff] }
  0x2a   :  { %v253_v58 = vsub.f32 8.0, %v245_v35  ;;  %v256_v59 = vmul.f32 7.6293945e-06, %v248_v42  ;;  %v116_v63 = vmul.f32 %v100_v44, %v100_v44  ;;  %v257_v0 = vmul.f32 7.6293945e-06, %v249_v45  ;;  %v75_v35 = vld [vmem:[#allocation2 + $0x78] sm:$0xff] }
  0x2b   :  { %v258_v1 = vmul.f32 7.6293945e-06, %v250_v46  ;;  %v259_v2 = vmul.f32 7.6293945e-06, %v251_v47  ;;  %v118_v6 = vmul.f32 %v102_v48, %v102_v48  ;;  %v254_v7 = vsub.f32 8.0, %v246_v50 }
  0x2c   :  { %v260_v8 = vmul.f32 7.6293945e-06, %v252_v51  ;;  %v264_v9 = vmul.f32 %v256_v59, %v108_v49  ;;  %v120_v13 = vmul.f32 %v104_v52, %v104_v52  ;;  %v122_v14 = vmul.f32 %v106_v53, %v106_v53 }
  0x2d   :  { %v266_v15 = vmul.f32 %v257_v0, %v110_v54  ;;  %v268_v16 = vmul.f32 %v258_v1, %v112_v55  ;;  %v255_v20 = vsub.f32 8.0, %v247_v57  ;;  %v261_v21 = vmul.f32 7.6293945e-06, %v253_v58 }
  0x2e   :  { %v270_v22 = vmul.f32 %v259_v2, %v114_v56  ;;  %v93_v23 = vsub.f32 %v61_v60, %v77_v5  ;;  %v95_v27 = vsub.f32 %v63_v61, %v79_v10  ;;  %v97_v28 = vsub.f32 %v65_v62, %v81_v11 }
  0x2f   :  { %v282_v24 = vadd.f32 %v266_v15, %v264_v9  ;;  %v99_v29 = vsub.f32 %v67_v3, %v83_v12  ;;  %v262_v30 = vmul.f32 7.6293945e-06, %v254_v7  ;;  %v272_v31 = vmul.f32 %v260_v8, %v116_v63 }
  0x30   :  { %v101_v32 = vsub.f32 %v69_v4, %v85_v18  ;;  %v103_v33 = vsub.f32 %v71_v17, %v87_v19  ;;  %v109_v37 = vmul.f32 %v93_v23, %v93_v23  ;;  %v111_v38 = vmul.f32 %v95_v27, %v95_v27 }
  0x31   :  { %v283_v34 = vadd.f32 %v282_v24, %v268_v16  ;;  %v113_v39 = vmul.f32 %v97_v28, %v97_v28  ;;  %v263_v40 = vmul.f32 7.6293945e-06, %v255_v20  ;;  %v274_v41 = vmul.f32 %v261_v21, %v118_v6 }
  0x32   :  { %v105_v42 = vsub.f32 %v73_v25, %v89_v26  ;;  %v115_v43 = vmul.f32 %v99_v29, %v99_v29  ;;  %v117_v45 = vmul.f32 %v101_v32, %v101_v32  ;;  %v265_v46 = vmul.f32 %v256_v59, %v109_v37 }
  0x33   :  { %v284_v44 = vadd.f32 %v283_v34, %v270_v22  ;;  %v267_v47 = vmul.f32 %v257_v0, %v111_v38  ;;  %v276_v48 = vmul.f32 %v262_v30, %v120_v13  ;;  %v107_v49 = vsub.f32 %v75_v35, %v91_v36 }
  0x34   :  { %v269_v50 = vmul.f32 %v258_v1, %v113_v39  ;;  %v119_v52 = vmul.f32 %v103_v33, %v103_v33  ;;  %v271_v53 = vmul.f32 %v259_v2, %v115_v43  ;;  %v278_v55 = vmul.f32 %v263_v40, %v122_v14 }
  0x35   :  { %v285_v51 = vadd.f32 %v284_v44, %v272_v31  ;;  %v289_v54 = vadd.f32 %v267_v47, %v265_v46  ;;  %v121_v57 = vmul.f32 %v105_v42, %v105_v42  ;;  %v273_v58 = vmul.f32 %v260_v8, %v117_v45 }
  0x36   :  { %v123_v62 = vmul.f32 %v107_v49, %v107_v49  ;;  %v275_v63 = vmul.f32 %v261_v21, %v119_v52 }
  0x37   :  { %v286_v56 = vadd.f32 %v285_v51, %v274_v41  ;;  %v290_v60 = vadd.f32 %v289_v54, %v269_v50  ;;  %v277_v5 = vmul.f32 %v262_v30, %v121_v57 }
  0x38   :  { %v279_v0 = vmul.f32 %v263_v40, %v123_v62 }
  0x39   :  { %v287_v61 = vadd.f32 %v286_v56, %v276_v48  ;;  %v291_v3 = vadd.f32 %v290_v60, %v271_v53 }
  0x3b   :  { %v288_v4 = vadd.f32 %v287_v61, %v278_v55  ;;  %v292_v59 = vadd.f32 %v291_v3, %v273_v58 }
  0x3d   :  { %v293_v6 = vadd.f32 %v292_v59, %v275_v63  ;;  %298 = vst [vmem:[#allocation7] sm:$0xff] %v288_v4 }
  0x3f   :  { %v294_v1 = vadd.f32 %v293_v6, %v277_v5 }
  0x41   :  { %v295_v2 = vadd.f32 %v294_v1, %v279_v0 }
  0x43   :  { %299 = vst [vmem:[#allocation7 + $0x8] sm:$0xff] %v295_v2 }
  0x44   :  { %373 = shalt.err (!%p370_p0)
}
  0x45   :  { %309 = dma.vmem_to_hbm [thread:$0]  %s307_s1, 256, %s419_s2, [#allocation4]  }
  0x46   :  { %386 = dma.done.wait [#allocation4], 256  }
  0x47   :  { %387 = vsyncadd [#allocation4], 4294967040 }
  0x48   :  { %313 = vsyncpa [#allocation3], 1 }
  0x49   :  { %314 = vsyncpa [#allocation6], 1 }
  0x4a   :  { %315 = vsyncpa [#allocation4], 1 }

</bundles_post_ra>
